<compile_context>
chip_gen: v7x
topology: tpu7x:2x2x1
jax: 0.10.0
libtpu: 0.0.40
codegen_flags: <defaults>
</compile_context>

<pallas_src>
import jax
import jax.numpy as jnp
from jax.experimental import pallas as pl
from jax.experimental.pallas import tpu as pltpu

STATE_DIM = 3
ACTION_DIM = 8
HIDDEN = 64

IN_AUG = 8            # 3 state features + ones channel (row 3) + 4 zero rows
H_AUG = HIDDEN + 8    # 64 hidden + ones channel (row 64) + 7 zero rows (multiple of 8)


def dqn_kernel(x_ref, w1_ref, w2_ref, w3_ref, o_ref):
    # Batch-in-lanes: x_ref (IN_AUG, TB), o_ref (ACTION_DIM, TB); weights are resident.
    x = x_ref[...]                                                        # (8, TB) f32

    # fc1 (+ bias via the ones channel), f32 MXU matmul.
    h1 = jnp.dot(w1_ref[...], x, preferred_element_type=jnp.float32)     # (72, TB)
    h1 = jnp.maximum(h1, 0.0).astype(jnp.bfloat16)

    # fc2 / fc3: bf16 MXU inputs, f32 accumulation; biases folded via the ones channel.
    h2 = jnp.dot(w2_ref[...], h1, preferred_element_type=jnp.float32)    # (72, TB)
    h2 = jnp.maximum(h2, 0.0).astype(jnp.bfloat16)

    out = jnp.dot(w3_ref[...], h2, preferred_element_type=jnp.float32)   # (8, TB)
    o_ref[...] = out.astype(o_ref.dtype)                                 # lane-dense store


def _round_up(n, m):
    return ((n + m - 1) // m) * m


def dqn_forward(x, packed, *, tb=8192):
    """x: (B, STATE_DIM) f32, packed = pack_params(...). Returns (B, ACTION_DIM) f32."""
    w1a, w2a, w3a = packed
    B = x.shape[0]

    # Batch tile: multiple of 256 (fully unmasked 128-lane stores, even v7x split);
    # cap at ceil(B/2) so large batches always produce >= 2 grid steps for megacore.
    tb = max(256, _round_up(int(tb), 256))
    b_ceil = _round_up(B, 256)
    TB = min(tb, max(256, _round_up(pl.cdiv(b_ceil, 2), 256)))
    B_pad = _round_up(B, TB)
    num_tiles = B_pad // TB

    # Augmented, transposed input: rows 0..2 = state, row 3 = 1 (bias channel), 4..7 = 0.
    x_aug = jnp.concatenate(
        [x.astype(jnp.float32),
         jnp.ones((B, 1), jnp.float32),
         jnp.zeros((B, IN_AUG - STATE_DIM - 1), jnp.float32)], axis=1)    # (B, 8)
    if B_pad != B:
        x_aug = jnp.pad(x_aug, ((0, B_pad - B), (0, 0)))                  # padded cols -> 0 out
    xT = x_aug.T                                                          # (8, B_pad)

    outT = pl.pallas_call(
        dqn_kernel,
        out_shape=jax.ShapeDtypeStruct((ACTION_DIM, B_pad), jnp.float32),
        grid_spec=pltpu.PrefetchScalarGridSpec(
            num_scalar_prefetch=0,
            grid=(num_tiles,),
            in_specs=[
                pl.BlockSpec((IN_AUG, TB), lambda i: (0, i)),             # x tile (batch in lanes)
                pl.BlockSpec((H_AUG, IN_AUG), lambda i: (0, 0)),          # resident fc1 weights
                pl.BlockSpec((H_AUG, H_AUG), lambda i: (0, 0)),           # resident fc2 weights
                pl.BlockSpec((ACTION_DIM, H_AUG), lambda i: (0, 0)),      # resident fc3 weights
            ],
            out_specs=pl.BlockSpec((ACTION_DIM, TB), lambda i: (0, i)),
        ),
        compiler_params=pltpu.CompilerParams(
            dimension_semantics=("parallel",),        # megacore sharding on v7x
            vmem_limit_bytes=64 * 1024 * 1024,
        ),
    )(xT, w1a, w2a, w3a)

    return outT[:, :B].T                                                  # (B, ACTION_DIM)


def init_params(key):
    # Deterministic synthetic init (PyTorch-style uniform ranges per layer),
    # weights stored [in_features, out_features] so reference computes y = x @ W + b.
    ks = jax.random.split(key, 6)

    def linear(kw, kb, fan_in, fan_out):
        bound = 1.0 / jnp.sqrt(fan_in)
        w = jax.random.uniform(kw, (fan_in, fan_out), jnp.float32, -bound, bound)
        b = jax.random.uniform(kb, (1, fan_out), jnp.float32, -bound, bound)
        return w, b

    w1, b1 = linear(ks[0], ks[1], STATE_DIM, HIDDEN)
    w2, b2 = linear(ks[2], ks[3], HIDDEN, HIDDEN)
    w3, b3 = linear(ks[4], ks[5], HIDDEN, ACTION_DIM)
    return (w1, b1, w2, b2, w3, b3)


def pack_params(params):
    """Pack weights for the transposed kernel; biases folded into an extra 'ones' column."""
    w1, b1, w2, b2, w3, b3 = params

    # fc1 (f32): (H_AUG, IN_AUG).  Col 3 = bias (the ones row of x); [HIDDEN, 3] = 1
    # so h1[HIDDEN] becomes the ones channel for fc2's bias.
    w1a = jnp.zeros((H_AUG, IN_AUG), jnp.float32)
    w1a = w1a.at[:HIDDEN, :STATE_DIM].set(w1.T)
    w1a = w1a.at[:HIDDEN, STATE_DIM].set(b1.reshape(HIDDEN))
    w1a = w1a.at[HIDDEN, STATE_DIM].set(1.0)

    # fc2 (bf16): (H_AUG, H_AUG).  Col HIDDEN = bias; [HIDDEN, HIDDEN] = 1 propagates ones.
    w2a = jnp.zeros((H_AUG, H_AUG), jnp.float32)
    w2a = w2a.at[:HIDDEN, :HIDDEN].set(w2.T)
    w2a = w2a.at[:HIDDEN, HIDDEN].set(b2.reshape(HIDDEN))
    w2a = w2a.at[HIDDEN, HIDDEN].set(1.0)

    # fc3 (bf16): (ACTION_DIM, H_AUG).  Col HIDDEN = bias.
    w3a = jnp.zeros((ACTION_DIM, H_AUG), jnp.float32)
    w3a = w3a.at[:, :HIDDEN].set(w3.T)
    w3a = w3a.at[:, HIDDEN].set(b3.reshape(ACTION_DIM))

    return (w1a, w2a.astype(jnp.bfloat16), w3a.astype(jnp.bfloat16))


def dqn_reference(x, params):
    w1, b1, w2, b2, w3, b3 = params
    h1 = jnp.maximum(x @ w1 + b1, 0.0)
    h2 = jnp.maximum(h1 @ w2 + b2, 0.0)
    return h2 @ w3 + b3


if __name__ == "__main__":
    key = jax.random.PRNGKey(0)
    k_params, k_x1, k_x2 = jax.random.split(key, 3)
    params = init_params(k_params)
    packed = pack_params(params)

    # bf16 MXU inputs (f32 accumulate) -> tolerance relaxed vs. the pure-f32 reference.
    tol = dict(atol=5e-2, rtol=5e-2)

    # Small single-tile case.
    x1 = jax.random.normal(k_x1, (8, STATE_DIM), jnp.float32)
    out1 = jax.block_until_ready(dqn_forward(x1, packed))
    ref1 = dqn_reference(x1, params)
    assert out1.shape == (8, ACTION_DIM), out1.shape
    assert jnp.allclose(out1, ref1, **tol), "mismatch vs reference (B=8)"

    # Ragged multi-tile case (exercises the batch grid, padding, and weight residency).
    x2 = jax.random.normal(k_x2, (600, STATE_DIM), jnp.float32)
    out2 = jax.block_until_ready(dqn_forward(x2, packed, tb=256))
    ref2 = dqn_reference(x2, params)
    assert out2.shape == (600, ACTION_DIM), out2.shape
    assert jnp.allclose(out2, ref2, **tol), "mismatch vs reference (B=600)"

    print("KERNEL_OK")
</pallas_src>

<mosaic_0001>
module attributes {stable_mosaic.version = 11 : i64} {
  func.func @dqn_kernel(%arg0: i32, %arg1: memref<8x256xf32, #tpu.memory_space<vmem>>, %arg2: memref<72x8xf32, #tpu.memory_space<vmem>>, %arg3: memref<72x72xbf16, #tpu.memory_space<vmem>>, %arg4: memref<8x72xbf16, #tpu.memory_space<vmem>>, %arg5: memref<8x256xf32, #tpu.memory_space<vmem>>) attributes {dimension_semantics = [#tpu.dimension_semantics<parallel>], iteration_bounds = array<i64: 1>, scalar_prefetch = 0 : i64, scratch_operands = 0 : i64, tpu.core_type = #tpu.core_type<tc>, window_params = [{transform_indices = @transform_0, window_bounds = array<i64: 8, 256>}, {pipeline_mode = #tpu.pipeline_mode<synchronous>, transform_indices = @transform_1, window_bounds = array<i64: 72, 8>}, {pipeline_mode = #tpu.pipeline_mode<synchronous>, transform_indices = @transform_2, window_bounds = array<i64: 72, 72>}, {pipeline_mode = #tpu.pipeline_mode<synchronous>, transform_indices = @transform_3, window_bounds = array<i64: 8, 72>}, {transform_indices = @transform_4, window_bounds = array<i64: 8, 256>}]} {
    %c0 = arith.constant 0 : index
    %c0_0 = arith.constant 0 : index
    %0 = vector.load %arg1[%c0, %c0_0] : memref<8x256xf32, #tpu.memory_space<vmem>>, vector<8x256xf32>
    %c0_1 = arith.constant 0 : index
    %c0_2 = arith.constant 0 : index
    %1 = vector.load %arg2[%c0_1, %c0_2] : memref<72x8xf32, #tpu.memory_space<vmem>>, vector<72x8xf32>
    %cst = arith.constant dense<0.000000e+00> : vector<72x256xf32>
    %2 = tpu.matmul %1, %0, %cst {dimension_numbers = #tpu.dot_dimension_numbers<[1], [0], [0], [1], [0, 0, 1, 1], [], []>} : vector<72x8xf32>, vector<8x256xf32>, vector<72x256xf32> -> vector<72x256xf32>
    %cst_3 = arith.constant 0.000000e+00 : f32
    %3 = vector.broadcast %cst_3 : f32 to vector<72x256xf32>
    %4 = arith.maximumf %2, %3 : vector<72x256xf32>
    %5 = arith.truncf %4 : vector<72x256xf32> to vector<72x256xbf16>
    %c0_4 = arith.constant 0 : index
    %c0_5 = arith.constant 0 : index
    %6 = vector.load %arg3[%c0_4, %c0_5] : memref<72x72xbf16, #tpu.memory_space<vmem>>, vector<72x72xbf16>
    %cst_6 = arith.constant dense<0.000000e+00> : vector<72x256xf32>
    %7 = tpu.matmul %6, %5, %cst_6 {dimension_numbers = #tpu.dot_dimension_numbers<[1], [0], [0], [1], [0, 0, 1, 1], [], []>} : vector<72x72xbf16>, vector<72x256xbf16>, vector<72x256xf32> -> vector<72x256xf32>
    %cst_7 = arith.constant 0.000000e+00 : f32
    %8 = vector.broadcast %cst_7 : f32 to vector<72x256xf32>
    %9 = arith.maximumf %7, %8 : vector<72x256xf32>
    %10 = arith.truncf %9 : vector<72x256xf32> to vector<72x256xbf16>
    %c0_8 = arith.constant 0 : index
    %c0_9 = arith.constant 0 : index
    %11 = vector.load %arg4[%c0_8, %c0_9] : memref<8x72xbf16, #tpu.memory_space<vmem>>, vector<8x72xbf16>
    %cst_10 = arith.constant dense<0.000000e+00> : vector<8x256xf32>
    %12 = tpu.matmul %11, %10, %cst_10 {dimension_numbers = #tpu.dot_dimension_numbers<[1], [0], [0], [1], [0, 0, 1, 1], [], []>} : vector<8x72xbf16>, vector<72x256xbf16>, vector<8x256xf32> -> vector<8x256xf32>
    %c0_11 = arith.constant 0 : index
    %c0_12 = arith.constant 0 : index
    %13 = vector.load %arg5[%c0_11, %c0_12] : memref<8x256xf32, #tpu.memory_space<vmem>>, vector<8x256xf32>
    tpu.vector_store %arg5[%c0_11, %c0_12], %12 {strides = array<i32>} : memref<8x256xf32, #tpu.memory_space<vmem>>, vector<8x256xf32>,
    return
  }
  func.func @transform_0(%arg0: i32) -> (i32, i32) {
    %c0_i32 = arith.constant 0 : i32
    %c0_i32_0 = arith.constant 0 : i32
    return %c0_i32, %arg0 : i32, i32
  }
  func.func @transform_1(%arg0: i32) -> (i32, i32) {
    %c0_i32 = arith.constant 0 : i32
    %c0_i32_0 = arith.constant 0 : i32
    %c0_i32_1 = arith.constant 0 : i32
    return %c0_i32, %c0_i32_0 : i32, i32
  }
  func.func @transform_2(%arg0: i32) -> (i32, i32) {
    %c0_i32 = arith.constant 0 : i32
    %c0_i32_0 = arith.constant 0 : i32
    %c0_i32_1 = arith.constant 0 : i32
    return %c0_i32, %c0_i32_0 : i32, i32
  }
  func.func @transform_3(%arg0: i32) -> (i32, i32) {
    %c0_i32 = arith.constant 0 : i32
    %c0_i32_0 = arith.constant 0 : i32
    %c0_i32_1 = arith.constant 0 : i32
    return %c0_i32, %c0_i32_0 : i32, i32
  }
  func.func @transform_4(%arg0: i32) -> (i32, i32) {
    %c0_i32 = arith.constant 0 : i32
    %c0_i32_0 = arith.constant 0 : i32
    return %c0_i32, %arg0 : i32, i32
  }
}

</mosaic_0001>

<bundles_post_ra>
// kernel: tpu_custom_call.1
= control target key start
LH: loop header
LB: loop body
LE: loop exit
PB: predicated region body
PF: predicated region fallthrough
CT: control target
= control target key end

     0   :  { %9 = vsyncpa [#allocation3], 0  ;;  %s767_s0 = inlined_call_operand.hbm [shape: f32[8,256], index: 0, kind: input, shape index: {}]   ;;  %s768_s1 = inlined_call_operand.hbm [shape: f32[72,8], index: 1, kind: input, shape index: {}]   ;;  %s769_s2 = inlined_call_operand.hbm [shape: bf16[72,72], index: 2, kind: input, shape index: {}]   ;;  %s770_s3 = inlined_call_operand.hbm [shape: bf16[8,72], index: 3, kind: input, shape index: {}]   ;;  %s771_s4 = inlined_call_operand.hbm [shape: f32[8,256], index: 4, kind: output, shape index: {}]  }
   0x1   :  { %10 = vsyncpa [#allocation6], 0 }
   0x2   :  { %11 = vsyncpa [#allocation9], 0 }
   0x3   :  { %12 = vsyncpa [#allocation4], 0  ;;  %s646_s15 = smov [#allocation5]   ;;  %s528_s19 = scalar_lea.hbm %s768_s1, 1152 }
   0x4   :  { %s28_s16 = sshll.u32 %s646_s15, 4  ;;  %p529_p0 = scmp.ne.s32.totalorder %s768_s1, %s528_s19  ;;  %s29_s16 = int_to_ptr.vmem [resolvable:$true] %s28_s16 }
   0x5   :  { %p532_p1 = scmp.lt.u32.totalorder %s528_s19, %s768_s1 }
   0x7   :  { %p534_p2 = pnand %p532_p1, %p529_p0 }
   0x9   :  { %537 = shalt.err (!%p534_p2)
}
   0xa   :  { %s538_s24 = scalar_lea.vmem %s29_s16, 1152  ;;  %p543_p4 = scmp.lt.s32.totalorder %s29_s16, %s29_s16 }
   0xb   :  { %p539_p3 = scmp.ne.s32.totalorder %s29_s16, %s538_s24  ;;  %p544_p5 = scmp.lt.s32.totalorder %s538_s24, %s538_s24 }
   0xd   :  { %p545_p6 = por %p544_p5, %p543_p4 }
   0xf   :  { %p546_p7 = pnand %p545_p6, %p539_p3 }
  0x11   :  { %549 = shalt.err (!%p546_p7)
}
  0x12   :  { %s647_s25 = smov 128   ;;  %s648_s26 = smov 8  }
  0x13   :  { %34 = dma.hbm_to_vmem [thread:$0]  %s768_s1, 1152, %s29_s16, [#allocation6], %s647_s25, %s647_s25, %s648_s26  }
  0x14   :  { %s649_s29 = smov [#allocation2]   ;;  %s650_s5 = smov [#allocation7]  }
  0x15   :  { %s19_s30 = sshll.u32 %s649_s29, 4  ;;  %s40_s6 = sshll.u32 %s650_s5, 4  ;;  %s20_s30 = int_to_ptr.vmem [resolvable:$true] %s19_s30  ;;  %s41_s6 = int_to_ptr.vmem [resolvable:$true] %s40_s6 }
  0x16   :  { %s550_s9 = scalar_lea.hbm %s767_s0, 256 }
  0x17   :  { %p551_p8 = scmp.ne.s32.totalorder %s767_s0, %s550_s9  ;;  %p554_p9 = scmp.lt.u32.totalorder %s550_s9, %s767_s0 }
  0x19   :  { %p556_p10 = pnand %p554_p9, %p551_p8 }
  0x1b   :  { %559 = shalt.err (!%p556_p10)
}
  0x1c   :  { %s560_s1 = scalar_lea.vmem %s20_s30, 256  ;;  %p565_p12 = scmp.lt.s32.totalorder %s20_s30, %s20_s30 }
  0x1d   :  { %p561_p11 = scmp.ne.s32.totalorder %s20_s30, %s560_s1  ;;  %p566_p13 = scmp.lt.s32.totalorder %s560_s1, %s560_s1 }
  0x1f   :  { %p567_p0 = por %p566_p13, %p565_p12 }
  0x21   :  { %p568_p1 = pnand %p567_p0, %p561_p11 }
  0x23   :  { %571 = shalt.err (!%p568_p1)
}
  0x24   :  { %22 = dma.hbm_to_vmem [thread:$0]  %s767_s0, 256, %s20_s30, [#allocation3]  }
  0x25   :  { %s572_s18 = scalar_lea.hbm %s769_s2, 576 }
  0x26   :  { %p573_p2 = scmp.ne.s32.totalorder %s769_s2, %s572_s18  ;;  %p576_p3 = scmp.lt.u32.totalorder %s572_s18, %s769_s2 }
  0x28   :  { %p578_p4 = pnand %p576_p3, %p573_p2 }
  0x2a   :  { %581 = shalt.err (!%p578_p4)
}
  0x2b   :  { %s582_s23 = scalar_lea.vmem %s41_s6, 576  ;;  %p587_p6 = scmp.lt.s32.totalorder %s41_s6, %s41_s6 }
  0x2c   :  { %p583_p5 = scmp.ne.s32.totalorder %s41_s6, %s582_s23  ;;  %p588_p7 = scmp.lt.s32.totalorder %s582_s23, %s582_s23 }
  0x2e   :  { %p589_p8 = por %p588_p7, %p587_p6 }
  0x30   :  { %p590_p9 = pnand %p589_p8, %p583_p5 }
  0x32   :  { %593 = shalt.err (!%p590_p9)
}
  0x33   :  { %s651_s0 = smov 64   ;;  %s652_s24 = smov 4  }
  0x34   :  { %46 = dma.hbm_to_vmem [thread:$0]  %s769_s2, 576, %s41_s6, [#allocation6], %s651_s0, %s651_s0, %s652_s24  }
  0x35   :  { %s653_s27 = smov [#allocation8]   ;;  %s594_s5 = scalar_lea.hbm %s770_s3, 64 }
  0x36   :  { %s53_s28 = sshll.u32 %s653_s27, 4  ;;  %p595_p10 = scmp.ne.s32.totalorder %s770_s3, %s594_s5  ;;  %s54_s28 = int_to_ptr.vmem [resolvable:$true] %s53_s28 }
  0x37   :  { %p598_p11 = scmp.lt.u32.totalorder %s594_s5, %s770_s3 }
  0x39   :  { %p600_p12 = pnand %p598_p11, %p595_p10 }
  0x3b   :  { %603 = shalt.err (!%p600_p12)
}
  0x3c   :  { %s604_s11 = scalar_lea.vmem %s54_s28, 64  ;;  %p609_p0 = scmp.lt.s32.totalorder %s54_s28, %s54_s28 }
  0x3d   :  { %p605_p13 = scmp.ne.s32.totalorder %s54_s28, %s604_s11  ;;  %p610_p1 = scmp.lt.s32.totalorder %s604_s11, %s604_s11 }
  0x3f   :  { %p611_p2 = por %p610_p1, %p609_p0 }
  0x41   :  { %p612_p3 = pnand %p611_p2, %p605_p13 }
  0x43   :  { %615 = shalt.err (!%p612_p3)
}
  0x44   :  { %56 = dma.hbm_to_vmem [thread:$0]  %s770_s3, 64, %s54_s28, [#allocation9]  }
  0x45   :  { %638 = dma.done.wait [#allocation3], 256  }
  0x46   :  { %639 = vsyncadd [#allocation3], 4294967040 }
  0x47   :  { %640 = dma.done.wait [#allocation6], 1728  }
  0x48   :  { %641 = vsyncadd [#allocation6], 4294965568 }
  0x49   :  { %642 = dma.done.wait [#allocation9], 64  }
  0x4a   :  { %643 = vsyncadd [#allocation9], 4294967232  ;;  %v654_v0 = vmov 0.0   ;;  %v71_v1 = vld [vmem:[#allocation2 + $0x8] sm:$0xff]  ;;  %v70_v2 = vld [vmem:[#allocation2] sm:$0xff]  ;;  %vm81_vm0 = vcmask 64512  }
  0x4b   :  { %173 = vmatprep.mubr.f32.mxu0 %v654_v0  ;;  %v72_v3 = vld [vmem:[#allocation5] sm:$0xff]  ;;  %109 = vmatprep.subr.mxu0 %v71_v1  ;;  %v73_v4 = vld [vmem:[#allocation5 + $0x8] sm:$0xff]  ;;  %v74_v5 = vld [vmem:[#allocation5 + $0x10] sm:$0xff]  ;;  %v655_v12 = vmov 0   ;;  %vm304_vm1 = vcmask 1043456   ;;  %vm288_vm2 = vcmask 588800  }
  0x4c   :  { %110 = vmatpush1.msra.mxu0 %v70_v2  ;;  %v75_v6 = vld [vmem:[#allocation5 + $0x18] sm:$0xff]  ;;  %v76_v7 = vld [vmem:[#allocation5 + $0x20] sm:$0xff]  ;;  %v77_v8 = vld [vmem:[#allocation5 + $0x28] sm:$0xff]  ;;  %343 = vmatprep.mubr.bf16.mxu1 %v655_v12  ;;  %s656_s3 = smov [#allocation10]  }
  0x4d   :  { %490 = vmatmul.mubr.msk.f32.vlgmr.msra.gmra.mrb[0].mxu0 %vm81_vm0, %v72_v3  ;;  %v78_v9 = vld [vmem:[#allocation5 + $0x30] sm:$0xff]  ;;  %v79_v10 = vld [vmem:[#allocation5 + $0x38] sm:$0xff]  ;;  %v80_v11 = vld [vmem:[#allocation5 + $0x40] sm:$0xff]  ;;  %s479_s12 = sshll.u32 %s656_s3, 4  ;;  %s480_s12 = int_to_ptr.vmem [resolvable:$true] %s479_s12 }
  0x4e   :  { %179 = vmatprep.mubr.f32.mxu0 %v654_v0  ;;  %v523_v60 = vld [vmem:[#allocation7] sm:$0xff]   ;;  %v524_v61 = vld [vmem:[#allocation7 + $0x8] sm:$0xff]   ;;  %v525_v62 = vld [vmem:[#allocation7 + $0x10] sm:$0xff]   ;;  %s616_s13 = scalar_lea.vmem %s480_s12, 256  ;;  %p621_p5 = scmp.lt.s32.totalorder %s480_s12, %s480_s12 }
  0x4f   :  { %v526_v63 = vld [vmem:[#allocation7 + $0x18] sm:$0xff]   ;;  %p617_p4 = scmp.ne.s32.totalorder %s480_s12, %s616_s13  ;;  %p622_p6 = scmp.lt.s32.totalorder %s616_s13, %s616_s13 }
  0x51   :  { %491 = vmatmul.mubr.msk.f32.gmra.mrb[2].mxu0 %vm81_vm0, %v73_v4  ;;  %p623_p7 = por %p622_p6, %p621_p5 }
  0x52   :  { %185 = vmatprep.mubr.f32.mxu0 %v654_v0 }
  0x53   :  { %p624_p8 = pnand %p623_p7, %p617_p4 }
  0x55   :  { %492 = vmatmul.mubr.msk.f32.gmra.mrb[4].mxu0 %vm81_vm0, %v74_v5 }
  0x56   :  { %191 = vmatprep.mubr.f32.mxu0 %v654_v0 }
  0x59   :  { %493 = vmatmul.mubr.msk.f32.gmra.mrb[6].mxu0 %vm81_vm0, %v75_v6 }
  0x5a   :  { %197 = vmatprep.mubr.f32.mxu0 %v654_v0 }
  0x5d   :  { %494 = vmatmul.mubr.msk.f32.gmra.mrb[8].mxu0 %vm81_vm0, %v76_v7 }
  0x5e   :  { %203 = vmatprep.mubr.f32.mxu0 %v654_v0 }
  0x61   :  { %495 = vmatmul.mubr.msk.f32.gmra.mrb[10].mxu0 %vm81_vm0, %v77_v8 }
  0x62   :  { %209 = vmatprep.mubr.f32.mxu0 %v654_v0 }
  0x65   :  { %496 = vmatmul.mubr.msk.f32.gmra.mrb[12].mxu0 %vm81_vm0, %v78_v9 }
  0x66   :  { %215 = vmatprep.mubr.f32.mxu0 %v654_v0 }
  0x69   :  { %497 = vmatmul.mubr.msk.f32.gmra.mrb[14].mxu0 %vm81_vm0, %v79_v10 }
  0x6a   :  { %221 = vmatprep.mubr.f32.mxu0 %v654_v0  ;;  %v527_v0 = vld [vmem:[#allocation7 + $0x20] ss:$0 sps:$4 sm:$0xff]  }
  0x6d   :  { %498 = vmatmul.mubr.msk.f32.gmra.mrb[16].mxu0 %vm81_vm0, %v80_v11 }
  0x6e   :  { %462 = vmatprep.mubr.bf16.mxu0 %v655_v12 }
 0x120   :  { %v175_v13 = vpop.f32.mrb[0].mxu0 }
 0x121   :  { %v177_v14 = vpop.f32.mrb[1].mxu0  ;;  %v228_v16 = vmax.f32 %v175_v13, 0.0 }
 0x122   :  { %v229_v19 = vmax.f32 %v177_v14, 0.0 }
 0x124   :  { %v181_v15 = vpop.f32.mrb[2].mxu0 }
 0x125   :  { %v230_v17 = vmax.f32 %v181_v15, 0.0  ;;  %v183_v18 = vpop.f32.mrb[3].mxu0 }
 0x126   :  { %v231_v20 = vmax.f32 %v183_v18, 0.0 }
 0x127   :  { %v246_v21 = vpack.c.bf16 %v230_v17, %v228_v16 }
 0x128   :  { %v187_v22 = vpop.f32.mrb[4].mxu0  ;;  %v247_v23 = vpack.c.bf16 %v231_v20, %v229_v19 }
 0x129   :  { %v189_v24 = vpop.f32.mrb[5].mxu0  ;;  %v232_v26 = vmax.f32 %v187_v22, 0.0 }
 0x12a   :  { %311 = vmatprep.subr.bf16.mxu1 %v247_v23  ;;  %v233_v29 = vmax.f32 %v189_v24, 0.0 }
 0x12b   :  { %312 = vmatpush1.bf16.msra.mxu1 %v246_v21 }
 0x12c   :  { %v193_v25 = vpop.f32.mrb[6].mxu0 }
 0x12d   :  { %v234_v27 = vmax.f32 %v193_v25, 0.0  ;;  %v195_v28 = vpop.f32.mrb[7].mxu0 }
 0x12e   :  { %v235_v30 = vmax.f32 %v195_v28, 0.0 }
 0x12f   :  { %v248_v31 = vpack.c.bf16 %v234_v27, %v232_v26 }
 0x130   :  { %v249_v32 = vpack.c.bf16 %v235_v30, %v233_v29  ;;  %v199_v33 = vpop.f32.mrb[8].mxu0 }
 0x131   :  { %v201_v34 = vpop.f32.mrb[9].mxu0  ;;  %v236_v36 = vmax.f32 %v199_v33, 0.0 }
 0x132   :  { %313 = vmatprep.subr.bf16.mxu1 %v249_v32  ;;  %v237_v39 = vmax.f32 %v201_v34, 0.0 }
 0x133   :  { %314 = vmatpush1.bf16.msra.mxu1 %v248_v31 }
 0x134   :  { %v205_v35 = vpop.f32.mrb[10].mxu0 }
 0x135   :  { %v238_v37 = vmax.f32 %v205_v35, 0.0  ;;  %v207_v38 = vpop.f32.mrb[11].mxu0 }
 0x136   :  { %v239_v40 = vmax.f32 %v207_v38, 0.0 }
 0x137   :  { %v250_v41 = vpack.c.bf16 %v238_v37, %v236_v36 }
 0x138   :  { %v251_v42 = vpack.c.bf16 %v239_v40, %v237_v39  ;;  %v211_v43 = vpop.f32.mrb[12].mxu0 }
 0x139   :  { %v213_v44 = vpop.f32.mrb[13].mxu0  ;;  %v240_v46 = vmax.f32 %v211_v43, 0.0 }
 0x13a   :  { %315 = vmatprep.subr.bf16.mxu1 %v251_v42  ;;  %v241_v49 = vmax.f32 %v213_v44, 0.0 }
 0x13b   :  { %316 = vmatpush1.bf16.msra.mxu1 %v250_v41 }
 0x13c   :  { %v217_v45 = vpop.f32.mrb[14].mxu0 }
 0x13d   :  { %v242_v47 = vmax.f32 %v217_v45, 0.0  ;;  %v219_v48 = vpop.f32.mrb[15].mxu0 }
 0x13e   :  { %v243_v50 = vmax.f32 %v219_v48, 0.0 }
 0x13f   :  { %v252_v51 = vpack.c.bf16 %v242_v47, %v240_v46 }
 0x140   :  { %v253_v52 = vpack.c.bf16 %v243_v50, %v241_v49  ;;  %v223_v53 = vpop.f32.mrb[16].mxu0  ;;  %v420_v50 = vld [vmem:[#allocation8] sm:$0xf] }
 0x141   :  { %v244_v54 = vmax.f32 %v223_v53, 0.0  ;;  %v225_v55 = vpop.f32.mrb[17].mxu0 }
 0x142   :  { %v245_v56 = vmax.f32 %v225_v55, 0.0  ;;  %317 = vmatprep.subr.bf16.mxu1 %v253_v52 }
 0x143   :  { %v254_v57 = vpack.c.bf16 %v244_v54, %v244_v54  ;;  %318 = vmatpush1.bf16.msra.mxu1 %v252_v51 }
 0x144   :  { %v255_v58 = vpack.c.bf16 %v245_v56, %v245_v56 }
 0x145   :  { %v306_v59 = vsel %vm304_vm1, %v254_v57, 0 }
 0x146   :  { %504 = vmatprep.subr.msk.bf16.mxu1 %vm304_vm1, %v255_v58 }
 0x147   :  { %320 = vmatpush1.bf16.msra.mxu1 %v306_v59 }
 0x14a   :  { %505 = vmatmul.mubr.msk.bf16.vlgmr.msra.gmra.mrb[0].mxu1 %vm288_vm2, %v523_v60 }
 0x14b   :  { %353 = vmatprep.mubr.bf16.mxu1 %v655_v12 }
 0x152   :  { %506 = vmatmul.mubr.msk.bf16.gmra.mrb[4].mxu1 %vm288_vm2, %v524_v61 }
 0x153   :  { %363 = vmatprep.mubr.bf16.mxu1 %v655_v12 }
 0x15a   :  { %507 = vmatmul.mubr.msk.bf16.gmra.mrb[8].mxu1 %vm288_vm2, %v525_v62 }
 0x15b   :  { %373 = vmatprep.mubr.bf16.mxu1 %v655_v12 }
 0x162   :  { %508 = vmatmul.mubr.msk.bf16.gmra.mrb[12].mxu1 %vm288_vm2, %v526_v63 }
 0x163   :  { %383 = vmatprep.mubr.bf16.mxu1 %v655_v12 }
 0x16a   :  { %509 = vmatmul.mubr.msk.bf16.gmra.mrb[16].mxu1 %vm288_vm2, %v527_v0 }
 0x21d   :  { %v345_v1 = vpop.f32.mrb[0].mxu1 }
 0x21e   :  { %v347_v2 = vpop.f32.mrb[1].mxu1  ;;  %v392_v4 = vmax.f32 %v345_v1, 0.0 }
 0x21f   :  { %v349_v3 = vpop.f32.mrb[2].mxu1  ;;  %v393_v7 = vmax.f32 %v347_v2, 0.0 }
 0x220   :  { %v394_v5 = vmax.f32 %v349_v3, 0.0  ;;  %v351_v6 = vpop.f32.mrb[3].mxu1 }
 0x221   :  { %v395_v8 = vmax.f32 %v351_v6, 0.0 }
 0x222   :  { %v410_v9 = vpack.c.bf16 %v394_v5, %v392_v4 }
 0x223   :  { %v411_v10 = vpack.c.bf16 %v395_v8, %v393_v7 }
 0x225   :  { %v355_v11 = vpop.f32.mrb[4].mxu1  ;;  %430 = vmatprep.subr.bf16.mxu0 %v411_v10 }
 0x226   :  { %v357_v13 = vpop.f32.mrb[5].mxu1  ;;  %431 = vmatpush1.bf16.msra.mxu0 %v410_v9  ;;  %v396_v15 = vmax.f32 %v355_v11, 0.0 }
 0x227   :  { %v359_v14 = vpop.f32.mrb[6].mxu1  ;;  %v397_v17 = vmax.f32 %v357_v13, 0.0 }
 0x228   :  { %v398_v12 = vmax.f32 %v359_v14, 0.0  ;;  %v361_v16 = vpop.f32.mrb[7].mxu1 }
 0x229   :  { %v399_v18 = vmax.f32 %v361_v16, 0.0 }
 0x22a   :  { %v412_v19 = vpack.c.bf16 %v398_v12, %v396_v15 }
 0x22b   :  { %v413_v20 = vpack.c.bf16 %v399_v18, %v397_v17 }
 0x22d   :  { %v365_v21 = vpop.f32.mrb[8].mxu1  ;;  %432 = vmatprep.subr.bf16.mxu0 %v413_v20 }
 0x22e   :  { %v367_v22 = vpop.f32.mrb[9].mxu1  ;;  %433 = vmatpush1.bf16.msra.mxu0 %v412_v19  ;;  %v400_v24 = vmax.f32 %v365_v21, 0.0 }
 0x22f   :  { %v369_v23 = vpop.f32.mrb[10].mxu1  ;;  %v401_v27 = vmax.f32 %v367_v22, 0.0 }
 0x230   :  { %v402_v25 = vmax.f32 %v369_v23, 0.0  ;;  %v371_v26 = vpop.f32.mrb[11].mxu1 }
 0x231   :  { %v403_v28 = vmax.f32 %v371_v26, 0.0 }
 0x232   :  { %v414_v29 = vpack.c.bf16 %v402_v25, %v400_v24 }
 0x233   :  { %v415_v30 = vpack.c.bf16 %v403_v28, %v401_v27 }
 0x235   :  { %v375_v31 = vpop.f32.mrb[12].mxu1  ;;  %434 = vmatprep.subr.bf16.mxu0 %v415_v30 }
 0x236   :  { %v377_v32 = vpop.f32.mrb[13].mxu1  ;;  %435 = vmatpush1.bf16.msra.mxu0 %v414_v29  ;;  %v404_v34 = vmax.f32 %v375_v31, 0.0 }
 0x237   :  { %v379_v33 = vpop.f32.mrb[14].mxu1  ;;  %v405_v37 = vmax.f32 %v377_v32, 0.0 }
 0x238   :  { %v406_v35 = vmax.f32 %v379_v33, 0.0  ;;  %v381_v36 = vpop.f32.mrb[15].mxu1 }
 0x239   :  { %v407_v38 = vmax.f32 %v381_v36, 0.0 }
 0x23a   :  { %v416_v39 = vpack.c.bf16 %v406_v35, %v404_v34 }
 0x23b   :  { %v417_v40 = vpack.c.bf16 %v407_v38, %v405_v37 }
 0x23d   :  { %v385_v41 = vpop.f32.mrb[16].mxu1  ;;  %436 = vmatprep.subr.bf16.mxu0 %v417_v40 }
 0x23e   :  { %v408_v42 = vmax.f32 %v385_v41, 0.0  ;;  %v387_v43 = vpop.f32.mrb[17].mxu1  ;;  %437 = vmatpush1.bf16.msra.mxu0 %v416_v39 }
 0x23f   :  { %v409_v44 = vmax.f32 %v387_v43, 0.0  ;;  %v389_v45 = vpop.f32.mrb[18].mxu1 }
 0x240   :  { %v418_v46 = vpack.c.bf16 %v408_v42, %v408_v42  ;;  %v390_v47 = vpop.f32.mrb[19].mxu1 }
 0x241   :  { %v419_v48 = vpack.c.bf16 %v409_v44, %v409_v44 }
 0x242   :  { %v425_v49 = vsel %vm304_vm1, %v418_v46, 0 }
 0x243   :  { %510 = vmatprep.subr.msk.bf16.mxu0 %vm304_vm1, %v419_v48 }
 0x244   :  { %439 = vmatpush1.bf16.msra.mxu0 %v425_v49 }
 0x247   :  { %511 = vmatmul.mubr.msk.bf16.vlgmr.msra.gmra.mrb[20].mxu0 %vm288_vm2, %v420_v50 }
 0x31a   :  { %v464_v51 = vpop.f32.mrb[20].mxu0 }
 0x31b   :  { %471 = vst [vmem:[#allocation10] sm:$0xff] %v464_v51  ;;  %v466_v52 = vpop.f32.mrb[21].mxu0 }
 0x31c   :  { %472 = vst [vmem:[#allocation10 + $0x8] sm:$0xff] %v466_v52  ;;  %v468_v53 = vpop.f32.mrb[22].mxu0 }
 0x31d   :  { %v469_v54 = vpop.f32.mrb[23].mxu0 }
 0x31e   :  { %627 = shalt.err (!%p624_p8)
}
 0x31f   :  { %s628_s15 = scalar_lea.hbm %s771_s4, 256 }
 0x320   :  { %p629_p9 = scmp.ne.s32.totalorder %s771_s4, %s628_s15  ;;  %p632_p10 = scmp.lt.u32.totalorder %s628_s15, %s771_s4 }
 0x322   :  { %p634_p11 = pnand %p632_p10, %p629_p9 }
 0x324   :  { %637 = shalt.err (!%p634_p11)
}
 0x325   :  { %482 = dma.vmem_to_hbm [thread:$0]  %s480_s12, 256, %s771_s4, [#allocation4]  }
 0x326   :  { %644 = dma.done.wait [#allocation4], 256  }
 0x327   :  { %645 = vsyncadd [#allocation4], 4294967040 }
 0x328   :  { %486 = vsyncpa [#allocation3], 1 }
 0x329   :  { %487 = vsyncpa [#allocation6], 1 }
 0x32a   :  { %488 = vsyncpa [#allocation9], 1 }
 0x32b   :  { %489 = vsyncpa [#allocation4], 1 }

</bundles_post_ra>
